<compile_context>
chip_gen: v6e
topology: v6e:2x2x1
jax: 0.10.0
libtpu: 0.0.40
codegen_flags: <defaults>
</compile_context>

<pallas_src>
import jax
import jax.numpy as jnp
from jax.experimental import pallas as pl
from jax.experimental.pallas import tpu as pltpu


# --------------------------------------------------------------------------
# Kernel
# --------------------------------------------------------------------------

def _patch_unembed_kernel(x_ref, o_ref):
    # x_ref: (tL, C) token tile (rows = spatial positions, cols = channels)
    # o_ref: (C, tL) channels-first tile (lane dim = spatial -> dense vst)
    o_ref[...] = x_ref[...].T


def _round_up(x, m):
    return ((x + m - 1) // m) * m


def _pick_tile_l(B, L, C, itemsize, budget_bytes=12 * 1024 * 1024):
    """Row-tile size tL (multiple of 128) under a VMEM budget that accounts
    for lane/sublane padding and the transpose temporary, capped so the grid
    keeps >= ~8 total steps (pipelining + feeding both v7x TensorCores)."""
    if L <= 128:
        return L
    c_lane = _round_up(C, 128)   # input tile lane padding   (tL, c_lane)
    c_sub = _round_up(C, 8)      # output tile sublane padding (c_sub, tL)
    # 2x double-buffered input + 2x double-buffered output + ~1 transpose temp
    per_row = (2 * c_lane + 3 * c_sub) * itemsize
    t_budget = max(128, budget_bytes // max(per_row, 1))
    # Min-steps rule: at least ceil(8/B) L-steps (>=2) when L allows.
    min_l_steps = max(2, pl.cdiv(8, B))
    t_steps = pl.cdiv(L, min_l_steps)
    t = min(L, t_budget, t_steps, 2048)   # >2048 rows is past the roofline knee
    return max(128, (t // 128) * 128)


def patch_unembed(x, x_size):
    """x: (B, L, C) with L = D*H*W  ->  (B, C, D, H, W)."""
    B, L, C = x.shape
    D, H, W = x_size
    assert L == D * H * W, "token count must equal D*H*W"

    # Small-problem fallback: zero-arithmetic layout change; for tiny L the
    # per-call overhead and sub-2KiB strided stores make XLA's transpose as
    # fast or faster (best of all: fuse into the consumer and never
    # materialize (B, C, L)).
    if L < 512:
        return jnp.transpose(x, (0, 2, 1)).reshape(B, C, D, H, W)

    itemsize = jnp.dtype(x.dtype).itemsize
    tL = _pick_tile_l(B, L, C, itemsize)
    grid = (B, pl.cdiv(L, tL))

    # VMEM footprint of the chosen tile (with padding + temp), with headroom.
    c_lane = _round_up(C, 128)
    c_sub = _round_up(C, 8)
    footprint = (2 * tL * c_lane + 3 * c_sub * tL) * itemsize
    vmem_limit = int(min(24 * 1024 * 1024,
                         max(16 * 1024 * 1024, footprint + (2 << 20))))

    out = pl.pallas_call(
        _patch_unembed_kernel,
        out_shape=jax.ShapeDtypeStruct((B, C, L), x.dtype),
        grid=grid,
        # Leading batch dim squeezed out of the kernel refs; tail L-blocks are
        # handled by Pallas masking (tL stays a multiple of 128).
        in_specs=[pl.BlockSpec((None, tL, C), lambda b, i: (b, i, 0))],
        out_specs=pl.BlockSpec((None, C, tL), lambda b, i: (b, 0, i)),
        compiler_params=pltpu.CompilerParams(
            dimension_semantics=("parallel", "parallel"),
            vmem_limit_bytes=vmem_limit),
    )(x)

    # (B, C, L) is contiguous row-major -> the 5-D view is free.
    return out.reshape(B, C, D, H, W)


# --------------------------------------------------------------------------

if __name__ == "__main__":
    k1, k2 = jax.random.split(jax.random.PRNGKey(0))

    # Case 1: module-default-ish shapes; Pallas path, grid=(2, 4) -> 8 steps.
    B = 2
    D = H = W = 8            # x_size
    C = 96                   # embed_dim (module default)
    L = D * H * W            # 512
    x = jax.random.normal(k1, (B, L, C), dtype=jnp.float32)

    out = jax.block_until_ready(patch_unembed(x, (D, H, W)))
    ref = jnp.transpose(x, (0, 2, 1)).reshape(B, C, D, H, W)
    assert out.shape == (B, C, D, H, W) and out.dtype == x.dtype
    assert bool(jnp.array_equal(out, ref))

    # Case 2: L not a multiple of the 128-row tile -> exercises tail masking.
    D2 = H2 = W2 = 12        # L = 1728
    L2 = D2 * H2 * W2
    x2 = jax.random.normal(k2, (1, L2, C), dtype=jnp.float32)
    out2 = jax.block_until_ready(patch_unembed(x2, (D2, H2, W2)))
    ref2 = jnp.transpose(x2, (0, 2, 1)).reshape(1, C, D2, H2, W2)
    assert bool(jnp.array_equal(out2, ref2))

    print("KERNEL_OK")
</pallas_src>

<mosaic_0001>
module attributes {stable_mosaic.version = 11 : i64} {
  func.func @_patch_unembed_kernel(%arg0: i32, %arg1: i32, %arg2: memref<1x128x96xf32, #tpu.memory_space<vmem>>, %arg3: memref<1x96x128xf32, #tpu.memory_space<vmem>>) attributes {dimension_semantics = [#tpu.dimension_semantics<parallel>, #tpu.dimension_semantics<parallel>], iteration_bounds = array<i64: 2, 4>, scalar_prefetch = 0 : i64, scratch_operands = 0 : i64, tpu.core_type = #tpu.core_type<tc>, window_params = [{transform_indices = @transform_0, window_bounds = array<i64: 1, 128, 96>}, {transform_indices = @transform_1, window_bounds = array<i64: 1, 96, 128>}]} {
    %c0 = arith.constant 0 : index
    %c0_0 = arith.constant 0 : index
    %c0_1 = arith.constant 0 : index
    %0 = vector.load %arg2[%c0, %c0_0, %c0_1] : memref<1x128x96xf32, #tpu.memory_space<vmem>>, vector<1x128x96xf32>
    %1 = vector.shape_cast %0 : vector<1x128x96xf32> to vector<128x96xf32>
    %2 = tpu.transpose %1, [1, 0] : vector<128x96xf32> -> vector<96x128xf32>
    %c0_2 = arith.constant 0 : index
    %c0_3 = arith.constant 0 : index
    %c0_4 = arith.constant 0 : index
    %3 = vector.load %arg3[%c0_2, %c0_3, %c0_4] : memref<1x96x128xf32, #tpu.memory_space<vmem>>, vector<1x96x128xf32>
    %4 = vector.shape_cast %3 : vector<1x96x128xf32> to vector<96x128xf32>
    %5 = vector.shape_cast %2 : vector<96x128xf32> to vector<1x96x128xf32>
    tpu.vector_store %arg3[%c0_2, %c0_3, %c0_4], %5 {strides = array<i32>} : memref<1x96x128xf32, #tpu.memory_space<vmem>>, vector<1x96x128xf32>,
    return
  }
  func.func @transform_0(%arg0: i32, %arg1: i32) -> (i32, i32, i32) {
    %c0_i32 = arith.constant 0 : i32
    %c0_i32_0 = arith.constant 0 : i32
    return %arg0, %arg1, %c0_i32 : i32, i32, i32
  }
  func.func @transform_1(%arg0: i32, %arg1: i32) -> (i32, i32, i32) {
    %c0_i32 = arith.constant 0 : i32
    %c0_i32_0 = arith.constant 0 : i32
    return %arg0, %c0_i32, %arg1 : i32, i32, i32
  }
}

</mosaic_0001>

<bundles_post_ra>
// kernel: tpu_custom_call.1
= control target key start
LH: loop header
LB: loop body
LE: loop exit
PB: predicated region body
PF: predicated region fallthrough
CT: control target
= control target key end

     0   :  { %6 = vsyncpa [#allocation3], 0  ;;  %s656_s0 = inlined_call_operand.vmem [shape: f32[2,512,96], index: 0, kind: input, shape index: {}]   ;;  %s657_s1 = inlined_call_operand.hbm [shape: f32[2,96,512], index: 1, kind: output, shape index: {}]  }
   0x1   :  { %8 = vsyncpa [#allocation3 + $0x1], 0  ;;  %s496_s6 = smov 0   ;;  %s498_s7 = smov 0  }
   0x2   :  { %s500_s8 = smov 0   ;;  %s502_s9 = smov 0  }
   0x3   :  { %s504_s10 = smov 0   ;;  %s506_s11 = smov 0  }
   0x4   :  { %s508_s12 = smov 0   ;;  %s510_s13 = smov 0  }
   0x5 LB: > { %s301_s14 = sadd.s32 4294967295, %s480_s13   ;;  %s302_s15 = sadd.s32 4294967294, %s480_s13   ;;  %s480_s13 = sphi %s510_s13, %s14_s13   ;;  %s476_s12 = sphi %s508_s12, %s666_s12   ;;  %s472_s11 = sphi %s506_s11, %s665_s11   ;;  %s468_s10 = sphi %s504_s10, %s664_s10   ;;  %s464_s9 = sphi %s502_s9, %s663_s9   ;;  %s460_s8 = sphi %s500_s8, %s662_s8   ;;  %s456_s7 = sphi %s498_s7, %s661_s7   ;;  %s452_s6 = sphi %s496_s6, %s660_s6  }
   0x6   : > { %s23_s16 = sadd.s32 1, %s472_s11  ;;  %s26_s17 = sadd.s32 1, %s476_s12 }
   0x7   : > { %p24_p0 = scmp.ge.s32.totalorder %s23_s16, 4  ;;  %p73_p1 = scmp.ne.s32.totalorder %s460_s8, %s456_s7 }
   0x8   : > { %p74_p2 = scmp.eq.s32.totalorder %s301_s14, 7  ;;  %p79_p5 = scmp.ne.s32.totalorder %s456_s7, %s452_s6 }
   0x9   : > { %s668_s16 = smov (%p24_p0, %s23_s16), 0  ;;  %s670_s17 = smov (!%p24_p0, %s26_s17), %s476_s12 }
   0xa   : > { %s59_s18 = ssub.s32 %s472_s11, %s668_s16  ;;  %p547_p3 = por %p74_p2, %p73_p1 }
   0xb   : > { %p28_p4 = scmp.ge.s32.totalorder %s670_s17, 2  ;;  %p80_p6 = scmp.eq.s32.totalorder %s302_s15, 7 }
   0xc   : > { %p305_p7 = scmp.ge.s32.totalorder %s480_s13, 1  ;;  %p111_p9 = scmp.lt.s32.totalorder %s480_s13, 9 }
   0xd   : > { %s672_s17 = smov (%p28_p4, %s670_s17), 0  ;;  %p556_p8 = por %p80_p6, %p79_p5 }
   0xe   : > { %s58_s21 = ssub.s32 %s476_s12, %s672_s17  ;;  %s63_s22 = sadd.s32 1, %s460_s8 }
   0xf   : > { %s60_s23 = sor.u32 %s59_s18, %s58_s21  ;;  %p112_p10 = pnand %p305_p7, %p111_p9 }
  0x10   : > { %p61_p11 = scmp.eq.s32.totalorder %s60_s23, 0  ;;  %s306_s25 = sshll.u32 (!%p112_p10), %s464_s9, 4 }
  0x11   : > { %115 = sbr.rel (%p112_p10) target bundleno = 213 (0xd5), region = 24  ;;  %p136_p12 = scmp.lt.s32.totalorder (!%p112_p10), %s468_s10, 1 }
  0x12   : > { %s565_s24 = scalar_select %p61_p11, %s460_s8, %s63_s22  }
  0x13   : > { %p138_p13 = scmp.lt.s32.totalorder (!%p112_p10), %s306_s25, 63  ;;  %s132_s4 = sand.u32 (!%p112_p10), 1, %s456_s7  }
  0x14   : > { %s312_s5 = smul.u32 (!%p112_p10), 96, %s132_s4 }
  0x15   : > { %s313_s15 = smul.u32 (!%p112_p10), 48, %s468_s10 }
  0x16   : > { %s137_s26 = scalar_select %p136_p12, %s468_s10, 1 }
  0x17   : > { %s674_s25 = smov (!%p138_p13, %s306_s25), 63  ;;  %s134_s14 = scalar_lea.vmem [#allocation2], %s312_s5 }
  0x18   : > { %s307_s27 = sshll.u32 %s137_s26, 6  ;;  %s217_s18 = sadd.s32 %s464_s9, %s313_s15 }
  0x19   : > { %s141_s28 = sadd.s32 %s307_s27, %s674_s25  ;;  %s309_s21 = sshll.u32 %s217_s18, 7 }
  0x1a   : > { %s308_s29 = sshll.u32 %s141_s28, 3  ;;  %s220_s22 = sshll.u32 %s134_s14, 4  ;;  %s601_s22 = int_to_ptr.vmem [resolvable:$true] %s220_s22 }
  0x1b   : > { %s573_s3 = scalar_lea.vmem %s656_s0, %s308_s29  ;;  %s599_s26 = scalar_lea.hbm %s657_s1, %s309_s21 }
  0x1c   : > { %v145_v0 = vld [vmem:[%s573_s3] sm:$0xff]  ;;  %v146_v1 = vld [vmem:[%s573_s3 + $0x8] sm:$0xff]  ;;  %v147_v2 = vld [vmem:[%s573_s3 + $0x10] sm:$0xff]  ;;  %s605_s9 = scalar_lea.sflag [#allocation3], %s132_s4  ;;  %s388_s10 = scalar_lea.vmem %s601_s22, 1536 }
  0x1d   : > { %161 = vxpose.xlu0.b32.start [1/16] (narrow) %v145_v0, 96  ;;  %v148_v3 = vld [vmem:[%s573_s3 + $0x18] sm:$0xff]  ;;  %v149_v4 = vld [vmem:[%s573_s3 + $0x20] sm:$0xff]  ;;  %v150_v5 = vld [vmem:[%s573_s3 + $0x28] sm:$0xff]  ;;  %p389_p0 = scmp.ne.s32.totalorder %s601_s22, %s388_s10  ;;  %s482_s27 = smov [#allocation2]  }
  0x1e   : > { %v151_v6 = vld [vmem:[%s573_s3 + $0x30] sm:$0xff]  ;;  %v152_v7 = vld [vmem:[%s573_s3 + $0x38] sm:$0xff]  ;;  %v153_v8 = vld [vmem:[%s573_s3 + $0x40] sm:$0xff]  ;;  %s392_s28 = sshll.u32 %s482_s27, 4  ;;  %s393_s28 = int_to_ptr.vmem [resolvable:$false] %s392_s28 }
  0x1f   : > { %v154_v9 = vld [vmem:[%s573_s3 + $0x48] sm:$0xff]  ;;  %v155_v10 = vld [vmem:[%s573_s3 + $0x50] sm:$0xff]  ;;  %v156_v11 = vld [vmem:[%s573_s3 + $0x58] sm:$0xff]  ;;  %p390_p1 = pnand %p389_p0, %p547_p3  ;;  %s394_s29 = scalar_lea.vmem %s393_s28, 3072 }
  0x20   : > { %v157_v12 = vld [vmem:[%s573_s3 + $0x60] sm:$0xff]  ;;  %v158_v13 = vld [vmem:[%s573_s3 + $0x68] sm:$0xff]  ;;  %v159_v14 = vld [vmem:[%s573_s3 + $0x70] sm:$0xff]  ;;  %p395_p4 = scmp.lt.s32.totalorder %s601_s22, %s393_s28  ;;  %p396_p5 = scmp.lt.s32.totalorder %s394_s29, %s388_s10 }
  0x21   : > { %162 = vxpose.xlu0.b32.cont [2/16] (narrow) %v146_v1, 96  ;;  %v160_v15 = vld [vmem:[%s573_s3 + $0x78] sm:$0xff]  ;;  %p391_p2 = pneg %p390_p1 }
  0x22   : > { %p397_p6 = por %p396_p5, %p395_p4 }
  0x24   : > { %p398_p7 = pnand %p397_p6, %p391_p2 }
  0x25   : > { %163 = vxpose.xlu0.b32.cont [3/16] (narrow) %v147_v2, 96 }
  0x29   : > { %164 = vxpose.xlu0.b32.cont [4/16] (narrow) %v148_v3, 96 }
  0x2d   : > { %165 = vxpose.xlu0.b32.cont [5/16] (narrow) %v149_v4, 96 }
  0x31   : > { %166 = vxpose.xlu0.b32.cont [6/16] (narrow) %v150_v5, 96 }
  0x35   : > { %167 = vxpose.xlu0.b32.cont [7/16] (narrow) %v151_v6, 96 }
  0x39   : > { %168 = vxpose.xlu0.b32.cont [8/16] (narrow) %v152_v7, 96 }
  0x3d   : > { %169 = vxpose.xlu0.b32.cont [9/16] (narrow) %v153_v8, 96 }
  0x41   : > { %170 = vxpose.xlu0.b32.cont [10/16] (narrow) %v154_v9, 96 }
  0x45   : > { %171 = vxpose.xlu0.b32.cont [11/16] (narrow) %v155_v10, 96 }
  0x49   : > { %172 = vxpose.xlu0.b32.cont [12/16] (narrow) %v156_v11, 96 }
  0x4d   : > { %173 = vxpose.xlu0.b32.cont [13/16] (narrow) %v157_v12, 96 }
  0x51   : > { %174 = vxpose.xlu0.b32.cont [14/16] (narrow) %v158_v13, 96 }
  0x55   : > { %175 = vxpose.xlu0.b32.cont [15/16] (narrow) %v159_v14, 96 }
  0x59   : > { %176 = vxpose.xlu0.b32.end [16/16] (narrow) %v160_v15, 96 }
  0x99   : > { %v177_v16 = vpop.trf.xlu0 }
  0x9a   : > { %193 = vst [vmem:[%s134_s14] sm:$0xff] %v177_v16 }
  0x9d   : > { %v178_v17 = vpop.trf.xlu0 }
  0x9e   : > { %194 = vst [vmem:[%s134_s14 + $0x8] sm:$0xff] %v178_v17 }
  0xa1   : > { %v179_v18 = vpop.trf.xlu0 }
  0xa2   : > { %195 = vst [vmem:[%s134_s14 + $0x10] sm:$0xff] %v179_v18 }
  0xa5   : > { %v180_v19 = vpop.trf.xlu0 }
  0xa6   : > { %196 = vst [vmem:[%s134_s14 + $0x18] sm:$0xff] %v180_v19 }
  0xa9   : > { %v181_v20 = vpop.trf.xlu0 }
  0xaa   : > { %197 = vst [vmem:[%s134_s14 + $0x20] sm:$0xff] %v181_v20 }
  0xad   : > { %v182_v21 = vpop.trf.xlu0 }
  0xae   : > { %198 = vst [vmem:[%s134_s14 + $0x28] sm:$0xff] %v182_v21 }
  0xb1   : > { %v183_v22 = vpop.trf.xlu0 }
  0xb2   : > { %199 = vst [vmem:[%s134_s14 + $0x30] sm:$0xff] %v183_v22 }
  0xb5   : > { %v184_v23 = vpop.trf.xlu0 }
  0xb6   : > { %200 = vst [vmem:[%s134_s14 + $0x38] sm:$0xff] %v184_v23 }
  0xb9   : > { %v185_v24 = vpop.trf.xlu0 }
  0xba   : > { %201 = vst [vmem:[%s134_s14 + $0x40] sm:$0xff] %v185_v24 }
  0xbd   : > { %v186_v25 = vpop.trf.xlu0 }
  0xbe   : > { %202 = vst [vmem:[%s134_s14 + $0x48] sm:$0xff] %v186_v25 }
  0xc1   : > { %v187_v26 = vpop.trf.xlu0 }
  0xc2   : > { %203 = vst [vmem:[%s134_s14 + $0x50] sm:$0xff] %v187_v26 }
  0xc5   : > { %v188_v27 = vpop.trf.xlu0 }
  0xc6   : > { %204 = vst [vmem:[%s134_s14 + $0x58] sm:$0xff] %v188_v27 }
  0xc7   : > { %401 = shalt.err (!%p398_p7)
}
  0xc8   : > { %s402_s30 = scalar_lea.hbm %s599_s26, 1536  ;;  %s406_s4 = scalar_lea.hbm %s657_s1, 12288 }
  0xc9   : > { %p403_p9 = scmp.ne.s32.totalorder %s599_s26, %s402_s30  ;;  %p407_p12 = scmp.lt.s32.totalorder %s599_s26, %s657_s1 }
  0xca   : > { %p408_p13 = scmp.lt.s32.totalorder %s406_s4, %s402_s30 }
  0xcb   : > { %p404_p10 = pnand %p403_p9, %p547_p3 }
  0xcc   : > { %p409_p0 = por %p408_p13, %p407_p12 }
  0xcd   : > { %p405_p11 = pneg %p404_p10 }
  0xcf   : > { %p410_p1 = pnand %p409_p0, %p405_p11 }
  0xd1   : > { %413 = shalt.err (!%p410_p1)
}
  0xd2   : > { %s483_s15 = smov 128   ;;  %s484_s18 = smov 512  }
  0xd3   : > { %s485_s21 = smov 8  }
  0xd4   : > { %314 = dma.vmem_to_hbm [thread:$0]  (%p547_p3), %s601_s22, 1536, %s599_s26, %s605_s9, %s483_s15, %s484_s18, %s485_s21  }
  0xd5 PF: > { %p320_p2 = scmp.ge.s32.totalorder %s480_s13, 2  ;;  %s235_s23 = sand.u32 1, %s452_s6  }
  0xd6   : > { %s236_s25 = scalar_lea.sflag [#allocation3], %s235_s23 }
  0xd7   : > { %p317_p4 = pnand %p320_p2, %p556_p8 }
  0xd9   : > { %p318_p5 = pneg %p317_p4 }
  0xdb   : > { %447 = dma.done.wait (%p318_p5), %s236_s25, 1536  }
  0xdc   : > { %449 = vsyncadd (%p318_p5), %s236_s25, 4294965760  ;;  %s14_s13 = sadd.s32 1, %s480_s13   ;;  %s660_s6 = smov %s456_s7 }
  0xdd   : > { %p11_p6 = scmp.ge.s32.totalorder %s14_s13, 10   ;;  %s661_s7 = smov %s460_s8 }
  0xde   : > { %s662_s8 = smov %s565_s24  ;;  %s663_s9 = smov %s472_s11 }
  0xdf   : > { %s664_s10 = smov %s476_s12  ;;  %s665_s11 = smov %s668_s16 }
  0xe0   : > { %s666_s12 = smov %s672_s17  ;;  %13 = sbr.rel (!%p11_p6) target bundleno = 5 (0x5), region = 59 }
  0xe5   :  { %241 = vsyncpa [#allocation3], 1 }
  0xe6   :  { %243 = vsyncpa [#allocation3 + $0x1], 1 }

</bundles_post_ra>
